<compile_context>
chip_gen: v7x
topology: tpu7x:2x2x1
jax: 0.10.0
libtpu: 0.0.40
codegen_flags: <defaults>
</compile_context>

<pallas_src>
import jax
import jax.numpy as jnp
from jax.experimental import pallas as pl
from jax.experimental.pallas import tpu as pltpu

_LANE = 128
_VMEM_LIMIT_BYTES = 48 * 1024 * 1024   # safe on v5e/v6e (128 MiB) and v7x (64 MiB)


def _channel_dropout_kernel(mask_ref, x_ref, o_ref):
    # mask_ref: (TC, 1)  per-(batch, channel) keep mask (0.0 / 1.0, in x.dtype)
    # x_ref   : (TC, TN) feature tile
    o_ref[...] = x_ref[...] * mask_ref[...]      # broadcast multiply over lanes (N)


def _round_down(v, m):
    return (v // m) * m


def _target_tile_bytes():
    """HBM-bound kernel: pick tile budget per TPU generation (fallback: 2 MiB)."""
    try:
        kind = jax.devices()[0].device_kind.lower()
    except Exception:
        return 2 * 1024 * 1024
    if "v7" in kind:
        return 8 * 1024 * 1024    # ~3.2 TB/s HBM -> amortize ~0.35 us/step overhead
    if "v6" in kind:
        return 4 * 1024 * 1024
    return 2 * 1024 * 1024        # v5e & anything unknown: stay inside small scoped VMEM


def random_feature_dropout(x, p=0.5, seed=0, training=True):
    """RandomDropout.forward: theta ~ U(0, p), whole-channel dropout, no rescaling."""
    if not training:
        return x
    B, C, N = x.shape
    itemsize = jnp.dtype(x.dtype).itemsize

    # theta ~ Uniform(0, p) (the torch.Tensor(1).uniform_(0, p) draw) and the
    # per-(batch, channel) Bernoulli keep mask, computed once in plain JAX
    # (trivial traffic: B*C elements).  Same mask is reused across all N tiles.
    key_theta, key_mask = jax.random.split(jax.random.PRNGKey(seed))
    theta = jax.random.uniform(key_theta, (), minval=0.0, maxval=p, dtype=jnp.float32)
    u = jax.random.uniform(key_mask, (B, C), dtype=jnp.float32)
    keep = (u >= theta).astype(x.dtype).reshape(B * C, 1)   # 1.0 keep / 0.0 drop

    rows = B * C
    x2 = x.reshape(rows, N)                 # free: row-major contiguous reshape

    # ---- Tile selection ----------------------------------------------------
    target = _target_tile_bytes()
    pack = max(8, 32 // itemsize)           # sublane pack: f32->8, bf16->16, int8->32

    # Lane tile: full N when tiny, else a multiple of 128 capped by the tile
    # budget; the ragged last N tile is masked by Pallas automatically.
    if N <= _LANE:
        tn = N
    else:
        tn_cap = max(_LANE, _round_down(target // (pack * itemsize), _LANE))
        tn = min(_round_down(N, _LANE), tn_cap)

    # Row tile: sublane-dense, filling the remaining tile budget.
    tc_cap = max(pack, _round_down(target // (tn * itemsize), pack))
    tc = rows if rows <= tc_cap else tc_cap

    row_blocks = pl.cdiv(rows, tc)
    n_blocks = pl.cdiv(N, tn)

    # Largest axis first so megacore (v7x: 2 TCs) gets an even parallel split.
    if row_blocks >= n_blocks:
        grid = (row_blocks, n_blocks)
        x_map = lambda r, c: (r, c)
        m_map = lambda r, c: (r, 0)
    else:
        grid = (n_blocks, row_blocks)
        x_map = lambda c, r: (r, c)
        m_map = lambda c, r: (r, 0)

    out = pl.pallas_call(
        _channel_dropout_kernel,
        out_shape=jax.ShapeDtypeStruct((rows, N), x.dtype),
        grid=grid,
        in_specs=[
            pl.BlockSpec((tc, 1), m_map),     # keep mask (broadcast over lanes)
            pl.BlockSpec((tc, tn), x_map),    # x tile
        ],
        out_specs=pl.BlockSpec((tc, tn), x_map),
        compiler_params=pltpu.CompilerParams(
            dimension_semantics=("parallel", "parallel"),
            vmem_limit_bytes=_VMEM_LIMIT_BYTES,
        ),
        cost_estimate=pl.CostEstimate(
            flops=rows * N,
            transcendentals=0,
            bytes_accessed=(2 * rows * N + rows) * itemsize,
        ),
    )(keep, x2)

    return out.reshape(B, C, N)


if __name__ == "__main__":
    # (batch, channels, num_points) — channels-first pointnet feature layout.
    B, C, N = 2, 4, 256
    x = jax.random.normal(jax.random.PRNGKey(0), (B, C, N), dtype=jnp.float32)

    # Note: the original module passes `self.train` (a bound method, truthy),
    # so dropout is effectively always applied -> training=True.
    y = jax.block_until_ready(random_feature_dropout(x, p=0.5, seed=0, training=True))

    assert y.shape == x.shape and y.dtype == x.dtype
    # Every (b, c) channel must be either kept verbatim or fully zeroed.
    kept = jnp.all(y == x, axis=-1)
    zeroed = jnp.all(y == 0.0, axis=-1)
    assert bool(jnp.all(kept | zeroed)), "channels must be kept or fully dropped"

    # Exercise the non-multiple-of-128 (ragged last lane-tile) path.
    x2 = jax.random.normal(jax.random.PRNGKey(1), (2, 6, 200), dtype=jnp.float32)
    y2 = jax.block_until_ready(random_feature_dropout(x2, p=0.5, seed=3, training=True))
    assert y2.shape == x2.shape
    kept2 = jnp.all(y2 == x2, axis=-1)
    zeroed2 = jnp.all(y2 == 0.0, axis=-1)
    assert bool(jnp.all(kept2 | zeroed2))

    # Identity when not training.
    assert bool(jnp.all(random_feature_dropout(x, training=False) == x))

    print("KERNEL_OK")
</pallas_src>

<mosaic_0001>
module attributes {stable_mosaic.version = 11 : i64} {
  func.func @_channel_dropout_kernel(%arg0: i32, %arg1: i32, %arg2: memref<8x1xf32, #tpu.memory_space<vmem>>, %arg3: memref<8x256xf32, #tpu.memory_space<vmem>>, %arg4: memref<8x256xf32, #tpu.memory_space<vmem>>) attributes {dimension_semantics = [#tpu.dimension_semantics<parallel>, #tpu.dimension_semantics<parallel>], iteration_bounds = array<i64: 1, 1>, scalar_prefetch = 0 : i64, scratch_operands = 0 : i64, tpu.core_type = #tpu.core_type<tc>, window_params = [{transform_indices = @transform_0, window_bounds = array<i64: 8, 1>}, {transform_indices = @transform_1, window_bounds = array<i64: 8, 256>}, {transform_indices = @transform_2, window_bounds = array<i64: 8, 256>}]} {
    %c0 = arith.constant 0 : index
    %c0_0 = arith.constant 0 : index
    %0 = vector.load %arg3[%c0, %c0_0] : memref<8x256xf32, #tpu.memory_space<vmem>>, vector<8x256xf32>
    %c0_1 = arith.constant 0 : index
    %c0_2 = arith.constant 0 : index
    %1 = vector.load %arg2[%c0_1, %c0_2] : memref<8x1xf32, #tpu.memory_space<vmem>>, vector<8x1xf32>
    %2 = vector.broadcast %1 : vector<8x1xf32> to vector<8x256xf32>
    %3 = arith.mulf %0, %2 : vector<8x256xf32>
    %c0_3 = arith.constant 0 : index
    %c0_4 = arith.constant 0 : index
    %4 = vector.load %arg4[%c0_3, %c0_4] : memref<8x256xf32, #tpu.memory_space<vmem>>, vector<8x256xf32>
    tpu.vector_store %arg4[%c0_3, %c0_4], %3 {strides = array<i32>} : memref<8x256xf32, #tpu.memory_space<vmem>>, vector<8x256xf32>,
    return
  }
  func.func @transform_0(%arg0: i32, %arg1: i32) -> (i32, i32) {
    %c0_i32 = arith.constant 0 : i32
    %c0_i32_0 = arith.constant 0 : i32
    return %arg0, %c0_i32 : i32, i32
  }
  func.func @transform_1(%arg0: i32, %arg1: i32) -> (i32, i32) {
    %c0_i32 = arith.constant 0 : i32
    return %arg0, %arg1 : i32, i32
  }
  func.func @transform_2(%arg0: i32, %arg1: i32) -> (i32, i32) {
    %c0_i32 = arith.constant 0 : i32
    return %arg0, %arg1 : i32, i32
  }
}

</mosaic_0001>

<bundles_post_ra>
// kernel: tpu_custom_call.1
= control target key start
LH: loop header
LB: loop body
LE: loop exit
PB: predicated region body
PF: predicated region fallthrough
CT: control target
= control target key end

     0   :  { %7 = vsyncpa [#allocation3], 0  ;;  %s148_s0 = inlined_call_operand.vmem [shape: f32[8,1], index: 0, kind: input, shape index: {}]   ;;  %s149_s1 = inlined_call_operand.hbm [shape: f32[8,256], index: 1, kind: input, shape index: {}]   ;;  %s150_s2 = inlined_call_operand.hbm [shape: f32[8,256], index: 2, kind: output, shape index: {}]  }
   0x1   :  { %8 = vsyncpa [#allocation4], 0  ;;  %s103_s9 = smov [#allocation2]   ;;  %s55_s13 = scalar_lea.hbm %s149_s1, 256 }
   0x2   :  { %s17_s10 = sshll.u32 %s103_s9, 4  ;;  %p56_p0 = scmp.ne.s32.totalorder %s149_s1, %s55_s13  ;;  %s18_s10 = int_to_ptr.vmem [resolvable:$true] %s17_s10 }
   0x3   :  { %p59_p1 = scmp.lt.u32.totalorder %s55_s13, %s149_s1 }
   0x5   :  { %p61_p2 = pnand %p59_p1, %p56_p0 }
   0x7   :  { %64 = shalt.err (!%p61_p2)
}
   0x8   :  { %s65_s18 = scalar_lea.vmem %s18_s10, 256  ;;  %p70_p4 = scmp.lt.s32.totalorder %s18_s10, %s18_s10 }
   0x9   :  { %p66_p3 = scmp.ne.s32.totalorder %s18_s10, %s65_s18  ;;  %p71_p5 = scmp.lt.s32.totalorder %s65_s18, %s65_s18 }
   0xb   :  { %p72_p6 = por %p71_p5, %p70_p4 }
   0xd   :  { %p73_p7 = pnand %p72_p6, %p66_p3 }
   0xf   :  { %76 = shalt.err (!%p73_p7)
}
  0x10   :  { %20 = dma.hbm_to_vmem [thread:$0]  %s149_s1, 256, %s18_s10, [#allocation3]  }
  0x11   :  { %99 = dma.done.wait [#allocation3], 256  }
  0x12   :  { %100 = vsyncadd [#allocation3], 4294967040  ;;  %v104_v0 = vmov 0   ;;  %v26_v1 = vld [vmem:[%s148_s0] sm:$0xff]  ;;  %v25_v3 = vld [vmem:[#allocation2 + $0x8] sm:$0xff]  ;;  %s105_s23 = smov [#allocation5]  }
  0x13   :  { %54 = vset.pattern.permute.xlu0 %v104_v0  ;;  %v24_v2 = vld [vmem:[#allocation2] sm:$0xff]  ;;  %s42_s24 = sshll.u32 %s105_s23, 4  ;;  %s43_s24 = int_to_ptr.vmem [resolvable:$true] %s42_s24 }
  0x14   :  { %29 = vperm.xlu0 %54, %v26_v1   ;;  %s77_s1 = scalar_lea.vmem %s43_s24, 256  ;;  %p82_p9 = scmp.lt.s32.totalorder %s43_s24, %s43_s24 }
  0x15   :  { %p78_p8 = scmp.ne.s32.totalorder %s43_s24, %s77_s1  ;;  %p83_p10 = scmp.lt.s32.totalorder %s77_s1, %s77_s1 }
  0x17   :  { %p84_p11 = por %p83_p10, %p82_p9 }
  0x19   :  { %p85_p12 = pnand %p84_p11, %p78_p8 }
  0x93   :  { %v30_v4 = vpop.permute.xlu0 %29 }
  0x94   :  { %v32_v5 = vmul.f32 %v30_v4, %v24_v2  ;;  %v33_v6 = vmul.f32 %v30_v4, %v25_v3 }
  0x96   :  { %34 = vst [vmem:[#allocation5] sm:$0xff] %v32_v5  ;;  %35 = vst [vmem:[#allocation5 + $0x8] sm:$0xff] %v33_v6 }
  0x97   :  { %88 = shalt.err (!%p85_p12)
}
  0x98   :  { %s89_s26 = scalar_lea.hbm %s150_s2, 256 }
  0x99   :  { %p90_p13 = scmp.ne.s32.totalorder %s150_s2, %s89_s26  ;;  %p93_p0 = scmp.lt.u32.totalorder %s89_s26, %s150_s2 }
  0x9b   :  { %p95_p1 = pnand %p93_p0, %p90_p13 }
  0x9d   :  { %98 = shalt.err (!%p95_p1)
}
  0x9e   :  { %45 = dma.vmem_to_hbm [thread:$0]  %s43_s24, 256, %s150_s2, [#allocation4]  }
  0x9f   :  { %101 = dma.done.wait [#allocation4], 256  }
  0xa0   :  { %102 = vsyncadd [#allocation4], 4294967040 }
  0xa1   :  { %49 = vsyncpa [#allocation3], 1 }
  0xa2   :  { %50 = vsyncpa [#allocation4], 1 }

</bundles_post_ra>
